<compile_context>
chip_gen: v7x
topology: tpu7x:2x2x1
jax: 0.10.0
libtpu: 0.0.40
codegen_flags: <defaults>
</compile_context>

<pallas_src>
import functools

import jax
import jax.numpy as jnp
import numpy as np
from jax.experimental import pallas as pl
from jax.experimental.pallas import tpu as pltpu

EPS = 1e-5
_VMEM_LIMIT = 32 * 1024 * 1024


# ---------------------------------------------------------------------------
# Small helpers
# ---------------------------------------------------------------------------
def _scale_shift(mean, m2, gamma, beta, inv_n):
    """Fold train-mode BN (batch stats, biased variance) into scale/shift."""
    var = m2 * inv_n
    scale = gamma * jax.lax.rsqrt(var + EPS)
    shift = beta - mean * scale
    return scale, shift


def _welford_update(mean_ref, m2_ref, z, n_prev, first):
    """Merge this tile's *centered* stats into running (mean, M2) refs."""
    tn = float(z.shape[0])
    tmean = jnp.mean(z, axis=0, keepdims=True)
    tm2 = jnp.sum((z - tmean) ** 2, axis=0, keepdims=True)

    @pl.when(first)
    def _():
        mean_ref[...] = jnp.zeros_like(mean_ref)
        m2_ref[...] = jnp.zeros_like(m2_ref)

    na = n_prev * jnp.float32(1.0)          # traced int -> f32
    tot = na + tn
    delta = tmean - mean_ref[...]
    mean_ref[...] = mean_ref[...] + delta * (tn / tot)
    m2_ref[...] = m2_ref[...] + tm2 + (delta * delta) * (na * tn / tot)


def _conv1_rank1(x, w1):
    """Din (=3) rank-1 broadcast FMAs on the VPU instead of a padded MXU pass."""
    z = x[:, 0:1] * w1[0:1, :]
    for k in range(1, x.shape[1]):
        z = z + x[:, k:k + 1] * w1[k:k + 1, :]
    return z


# ---------------------------------------------------------------------------
# Pass A: bn1 statistics only (z1 is never written to HBM).
# ---------------------------------------------------------------------------
def conv1_stats_kernel(x_ref, w1_ref, mean_ref, m2_ref):
    r = pl.program_id(0)
    z = _conv1_rank1(x_ref[...], w1_ref[...])            # (Tr, C1) f32
    _welford_update(mean_ref, m2_ref, z, r * x_ref.shape[0], r == 0)


# ---------------------------------------------------------------------------
# Pass B: recompute conv1, bn1+ReLU, conv2 matmul -> z2 + bn2 stats.
# ---------------------------------------------------------------------------
def conv12_kernel(x_ref, w1_ref, mean1_ref, m21_ref, g1_ref, be1_ref, w2_ref,
                  z2_ref, mean2_ref, m22_ref, *, inv_n, dot):
    r = pl.program_id(0)
    z1 = _conv1_rank1(x_ref[...], w1_ref[...])
    sc, sh = _scale_shift(mean1_ref[...], m21_ref[...],
                          g1_ref[...], be1_ref[...], inv_n)
    a = jnp.maximum(z1 * sc + sh, 0.0)                    # bn1 + ReLU
    z2 = dot(a, w2_ref[...])                              # (Tr, C2) f32 acc
    _welford_update(mean2_ref, m22_ref, z2, r * z2.shape[0], r == 0)
    z2_ref[...] = z2.astype(z2_ref.dtype)


# ---------------------------------------------------------------------------
# Pass C: bn(prev)+ReLU -> matmul -> streamed activations + stats (conv3).
# ---------------------------------------------------------------------------
def conv_bn_mm_kernel(h_ref, meanp_ref, m2p_ref, g_ref, be_ref, w_ref,
                      z_ref, mean_ref, m2_ref, *, inv_n, dot):
    r = pl.program_id(0)
    sc, sh = _scale_shift(meanp_ref[...], m2p_ref[...],
                          g_ref[...], be_ref[...], inv_n)
    a = jnp.maximum(h_ref[...].astype(jnp.float32) * sc + sh, 0.0)
    z = dot(a, w_ref[...])
    _welford_update(mean_ref, m2_ref, z, r * z.shape[0], r == 0)
    z_ref[...] = z.astype(z_ref.dtype)


# ---------------------------------------------------------------------------
# Pass D: bn3+ReLU -> conv4 matmul fused with per-cloud streaming max/min
#         pooling of the raw pre-bn4 activations.  z4 never touches HBM.
# ---------------------------------------------------------------------------
def conv4_pool_kernel(h3_ref, mean3_ref, m23_ref, g3_ref, be3_ref, w4_ref,
                      maxz_ref, minz_ref, mean4_ref, m24_ref, *, inv_n, dot):
    b = pl.program_id(0)
    j = pl.program_id(1)
    nj = pl.num_programs(1)
    first = (b == 0) & (j == 0)

    sc, sh = _scale_shift(mean3_ref[...], m23_ref[...],
                          g3_ref[...], be3_ref[...], inv_n)
    a = jnp.maximum(h3_ref[0].astype(jnp.float32) * sc + sh, 0.0)   # (Tn, C3)
    z = dot(a, w4_ref[...])                                         # (Tn, C4)

    @pl.when(first)
    def _():
        maxz_ref[...] = jnp.full(maxz_ref.shape, -jnp.inf, maxz_ref.dtype)
        minz_ref[...] = jnp.full(minz_ref.shape, jnp.inf, minz_ref.dtype)

    _welford_update(mean4_ref, m24_ref, z, (b * nj + j) * z.shape[0], first)

    tmax = jnp.max(z, axis=0, keepdims=True)
    tmin = jnp.min(z, axis=0, keepdims=True)
    onb = jax.lax.broadcasted_iota(jnp.int32, maxz_ref.shape, 0) == b
    maxz_ref[...] = jnp.where(onb, jnp.maximum(maxz_ref[...], tmax), maxz_ref[...])
    minz_ref[...] = jnp.where(onb, jnp.minimum(minz_ref[...], tmin), minz_ref[...])


# ---------------------------------------------------------------------------
# Pass E: finalize bn4 on the pooled extrema + fused FC head.
# ---------------------------------------------------------------------------
def fc_head_kernel(maxz_ref, minz_ref, mean4_ref, m24_ref, g4_ref, be4_ref,
                   wf1_ref, gf1_ref, bef1_ref, wf2_ref, gf2_ref, bef2_ref,
                   wf3_ref, bf3_ref, out_ref, *, inv_n, dot):
    sc4, sh4 = _scale_shift(mean4_ref[...], m24_ref[...],
                            g4_ref[...], be4_ref[...], inv_n)
    # max_n(scale*z + shift) == scale*max_n(z)+shift if scale>=0 else
    #                           scale*min_n(z)+shift.
    pooled = jnp.where(sc4 >= 0.0,
                       maxz_ref[...] * sc4 + sh4,
                       minz_ref[...] * sc4 + sh4)          # (B, C4) f32

    def bn_relu(h, g, be):                                 # two-pass BN (in VMEM)
        m = jnp.mean(h, axis=0, keepdims=True)
        v = jnp.mean((h - m) ** 2, axis=0, keepdims=True)
        return jnp.maximum((h - m) / jnp.sqrt(v + EPS) * g + be, 0.0)

    a = bn_relu(dot(pooled, wf1_ref[...]), gf1_ref[...], bef1_ref[...])
    a = bn_relu(dot(a, wf2_ref[...]), gf2_ref[...], bef2_ref[...])
    out = dot(a, wf3_ref[...]) + bf3_ref[...]
    out_ref[...] = out.astype(out_ref.dtype)               # lane-dense store


# ---------------------------------------------------------------------------
# Wrapper
# ---------------------------------------------------------------------------
def _pick_tile(total, cap, gran):
    """Largest tile <= cap that divides `total` and is a multiple of `gran`;
    falls back to the full extent (always a legal block)."""
    if total <= cap:
        return total
    t = (cap // gran) * gran
    while t >= gran:
        if total % t == 0:
            return t
        t -= gran
    return total


def _rep(shape):
    """Spec for an operand that stays VMEM-resident across all grid steps."""
    return pl.BlockSpec(shape, lambda *_: (0,) * len(shape))


def _cost(flops, bytes_accessed, transcendentals=0):
    return pl.CostEstimate(flops=int(flops), transcendentals=int(transcendentals),
                           bytes_accessed=int(bytes_accessed))


def _cparams(ndims):
    return pltpu.CompilerParams(dimension_semantics=("arbitrary",) * ndims,
                                vmem_limit_bytes=_VMEM_LIMIT)


def decoder_conditional_x(x, params, *, mm_dtype=jnp.bfloat16,
                          row_tile_cap=1024, point_tile_cap=1024):
    """x: (B, N, input_dim) float32 -> (B, zdim) float32."""
    B, N, Din = x.shape
    R = B * N
    zdim = params["wf3"].shape[1]
    zp = ((zdim + 127) // 128) * 128
    f32 = jnp.float32
    itm = jnp.dtype(mm_dtype).itemsize
    sub = 8 if itm >= 4 else 16            # sublane granularity for blocks

    Tr = _pick_tile(R, row_tile_cap, sub)  # row tiles (kept <= 1024 for v7x VMEM)
    Tn = _pick_tile(N, point_tile_cap, sub)
    NJ = N // Tn
    inv_n = 1.0 / R

    # Match the f32 verification path to full-f32 MXU arithmetic.
    prec = jax.lax.Precision.HIGHEST if jnp.dtype(mm_dtype) == jnp.float32 else None

    def dot(a, w):
        return jnp.dot(a.astype(mm_dtype), w,
                       preferred_element_type=jnp.float32, precision=prec)

    c1 = params["w1"].shape[1]
    c2 = params["w2"].shape[1]
    c3 = params["w3"].shape[1]
    c4 = params["w4"].shape[1]
    c5 = params["wf1"].shape[1]
    c6 = params["wf2"].shape[1]

    x_rows = x.reshape(R, Din).astype(f32)
    w1f = params["w1"].astype(f32)

    # ---- Pass A: bn1 statistics (conv1 recomputed later, no z1 round-trip) --
    mean1, m21 = pl.pallas_call(
        conv1_stats_kernel,
        grid=(R // Tr,),
        in_specs=[pl.BlockSpec((Tr, Din), lambda r: (r, 0)), _rep((Din, c1))],
        out_specs=[_rep((1, c1)), _rep((1, c1))],
        out_shape=[jax.ShapeDtypeStruct((1, c1), f32)] * 2,
        compiler_params=_cparams(1),
        cost_estimate=_cost(2 * R * Din * c1 + 4 * R * c1,
                            R * Din * 4 + Din * c1 * 4),
    )(x_rows, w1f)

    # ---- Pass B: conv1(recompute)+bn1+ReLU -> conv2 -> z2 + bn2 stats --------
    z2, mean2, m22 = pl.pallas_call(
        functools.partial(conv12_kernel, inv_n=inv_n, dot=dot),
        grid=(R // Tr,),
        in_specs=[pl.BlockSpec((Tr, Din), lambda r: (r, 0)),
                  _rep((Din, c1)), _rep((1, c1)), _rep((1, c1)),
                  _rep((1, c1)), _rep((1, c1)), _rep((c1, c2))],
        out_specs=[pl.BlockSpec((Tr, c2), lambda r: (r, 0)),
                   _rep((1, c2)), _rep((1, c2))],
        out_shape=[jax.ShapeDtypeStruct((R, c2), mm_dtype),
                   jax.ShapeDtypeStruct((1, c2), f32),
                   jax.ShapeDtypeStruct((1, c2), f32)],
        compiler_params=_cparams(1),
        cost_estimate=_cost(2 * R * c1 * (Din + c2),
                            R * Din * 4 + R * c2 * itm + c1 * c2 * itm,
                            transcendentals=c1),
    )(x_rows, w1f, mean1, m21, params["g1"], params["be1"],
      params["w2"].astype(mm_dtype))

    # ---- Pass C: bn2+ReLU -> conv3 -> z3 + bn3 stats -------------------------
    z3, mean3, m23 = pl.pallas_call(
        functools.partial(conv_bn_mm_kernel, inv_n=inv_n, dot=dot),
        grid=(R // Tr,),
        in_specs=[pl.BlockSpec((Tr, c2), lambda r: (r, 0)),
                  _rep((1, c2)), _rep((1, c2)), _rep((1, c2)), _rep((1, c2)),
                  _rep((c2, c3))],
        out_specs=[pl.BlockSpec((Tr, c3), lambda r: (r, 0)),
                   _rep((1, c3)), _rep((1, c3))],
        out_shape=[jax.ShapeDtypeStruct((R, c3), mm_dtype),
                   jax.ShapeDtypeStruct((1, c3), f32),
                   jax.ShapeDtypeStruct((1, c3), f32)],
        compiler_params=_cparams(1),
        cost_estimate=_cost(2 * R * c2 * c3,
                            R * (c2 + c3) * itm + c2 * c3 * itm,
                            transcendentals=c2),
    )(z2, mean2, m22, params["g2"], params["be2"], params["w3"].astype(mm_dtype))

    # ---- Pass D: bn3+ReLU -> conv4 + fused per-cloud max/min pooling ---------
    maxz, minz, mean4, m24 = pl.pallas_call(
        functools.partial(conv4_pool_kernel, inv_n=inv_n, dot=dot),
        grid=(B, NJ),
        in_specs=[pl.BlockSpec((1, Tn, c3), lambda b, j: (b, j, 0)),
                  _rep((1, c3)), _rep((1, c3)), _rep((1, c3)), _rep((1, c3)),
                  _rep((c3, c4))],
        out_specs=[_rep((B, c4)), _rep((B, c4)), _rep((1, c4)), _rep((1, c4))],
        out_shape=[jax.ShapeDtypeStruct((B, c4), f32),
                   jax.ShapeDtypeStruct((B, c4), f32),
                   jax.ShapeDtypeStruct((1, c4), f32),
                   jax.ShapeDtypeStruct((1, c4), f32)],
        compiler_params=_cparams(2),
        cost_estimate=_cost(2 * R * c3 * c4,
                            R * c3 * itm + c3 * c4 * itm + 4 * B * c4 * 4,
                            transcendentals=c3),
    )(z3.reshape(B, N, c3), mean3, m23, params["g3"], params["be3"],
      params["w4"].astype(mm_dtype))

    # ---- Pass E: bn4 on pooled extrema + fused FC head -----------------------
    wf3p = jnp.zeros((c6, zp), f32).at[:, :zdim].set(params["wf3"]).astype(mm_dtype)
    bf3p = jnp.zeros((1, zp), f32).at[:, :zdim].set(params["bf3"])
    out = pl.pallas_call(
        functools.partial(fc_head_kernel, inv_n=inv_n, dot=dot),
        grid=(1,),
        in_specs=[_rep((B, c4)), _rep((B, c4)), _rep((1, c4)), _rep((1, c4)),
                  _rep((1, c4)), _rep((1, c4)),
                  _rep((c4, c5)), _rep((1, c5)), _rep((1, c5)),
                  _rep((c5, c6)), _rep((1, c6)), _rep((1, c6)),
                  _rep((c6, zp)), _rep((1, zp))],
        out_specs=_rep((B, zp)),
        out_shape=jax.ShapeDtypeStruct((B, zp), f32),
        compiler_params=_cparams(1),
        cost_estimate=_cost(2 * B * (c4 * c5 + c5 * c6 + c6 * zp),
                            (c4 * c5 + c5 * c6 + c6 * zp) * itm + 4 * B * c4 * 4,
                            transcendentals=c4 + c5 + c6),
    )(maxz, minz, mean4, m24, params["g4"], params["be4"],
      params["wf1"].astype(mm_dtype), params["gf1"], params["bef1"],
      params["wf2"].astype(mm_dtype), params["gf2"], params["bef2"],
      wf3p, bf3p)
    return out[:, :zdim]


# ---------------------------------------------------------------------------
# Parameters / pure-JAX reference (mirrors the PyTorch module, incl. biases)
# ---------------------------------------------------------------------------
def init_params(key, input_dim=3, zdim=32):
    dims_conv = [(input_dim, 128), (128, 128), (128, 256), (256, 512)]
    dims_fc = [(512, 256), (256, 128), (128, zdim)]
    params = {}
    keys = jax.random.split(key, 32)
    k = iter(keys)

    for i, (cin, cout) in enumerate(dims_conv, start=1):
        params[f"w{i}"] = (jax.random.normal(next(k), (cin, cout), jnp.float32)
                           * (1.0 / np.sqrt(cin)))
        params[f"b{i}"] = jax.random.normal(next(k), (1, cout), jnp.float32) * 0.1
        params[f"g{i}"] = 1.0 + jax.random.normal(next(k), (1, cout), jnp.float32) * 0.1
        params[f"be{i}"] = jax.random.normal(next(k), (1, cout), jnp.float32) * 0.1

    for i, (cin, cout) in enumerate(dims_fc, start=1):
        params[f"wf{i}"] = (jax.random.normal(next(k), (cin, cout), jnp.float32)
                            * (1.0 / np.sqrt(cin)))
        params[f"bf{i}"] = jax.random.normal(next(k), (1, cout), jnp.float32) * 0.1
        if i < 3:
            params[f"gf{i}"] = 1.0 + jax.random.normal(next(k), (1, cout), jnp.float32) * 0.1
            params[f"bef{i}"] = jax.random.normal(next(k), (1, cout), jnp.float32) * 0.1
    return params


def reference_forward(x, p):
    """Pure-JAX mirror of the PyTorch forward (training-mode BatchNorm)."""
    B, N, Din = x.shape
    hp = jax.lax.Precision.HIGHEST

    def mm(a, w):
        return jnp.dot(a, w, precision=hp)

    def bn(h, g, b, relu=True):
        m = h.mean(0, keepdims=True)
        v = ((h - m) ** 2).mean(0, keepdims=True)
        y = (h - m) / jnp.sqrt(v + EPS) * g + b
        return jnp.maximum(y, 0.0) if relu else y

    h = x.reshape(B * N, Din)
    h = bn(mm(h, p["w1"]) + p["b1"], p["g1"], p["be1"])
    h = bn(mm(h, p["w2"]) + p["b2"], p["g2"], p["be2"])
    h = bn(mm(h, p["w3"]) + p["b3"], p["g3"], p["be3"])
    h = bn(mm(h, p["w4"]) + p["b4"], p["g4"], p["be4"], relu=False)
    pooled = h.reshape(B, N, 512).max(axis=1)
    m = bn(mm(pooled, p["wf1"]) + p["bf1"], p["gf1"], p["bef1"])
    m = bn(mm(m, p["wf2"]) + p["bf2"], p["gf2"], p["bef2"])
    return mm(m, p["wf3"]) + p["bf3"]


if __name__ == "__main__":
    key = jax.random.PRNGKey(0)
    k_param, k_x = jax.random.split(key)

    B, N, input_dim, zdim = 2, 16, 3, 32
    params = init_params(k_param, input_dim=input_dim, zdim=zdim)
    x = jax.random.normal(k_x, (B, N, input_dim), jnp.float32)

    ref = reference_forward(x, params)

    # f32 accuracy path.  Small tile caps force multi-step grids (2 row tiles,
    # (2, 2) conv4+pool grid) so the streaming Welford-stats and streaming
    # max/min accumulation paths are exercised even at toy size.
    out_f32 = decoder_conditional_x(x, params, mm_dtype=jnp.float32,
                                    row_tile_cap=16, point_tile_cap=8)
    out_f32 = jax.block_until_ready(out_f32)
    assert out_f32.shape == (B, zdim)
    np.testing.assert_allclose(np.asarray(out_f32), np.asarray(ref),
                               rtol=5e-3, atol=5e-3)

    # Default fast path: bf16 matmul inputs / activation storage, f32
    # accumulation and BN statistics.  Train-mode BN over a batch of only 2
    # rows is extremely sensitive, so only a smoke check is done for bf16.
    out_bf16 = decoder_conditional_x(x, params, row_tile_cap=16)
    out_bf16 = jax.block_until_ready(out_bf16)
    assert out_bf16.shape == (B, zdim)
    assert bool(jnp.all(jnp.isfinite(out_bf16)))

    print("KERNEL_OK")
</pallas_src>

<mosaic_0001>
module attributes {stable_mosaic.version = 11 : i64} {
  func.func @conv1_stats_kernel(%arg0: i32, %arg1: memref<16x3xf32, #tpu.memory_space<vmem>>, %arg2: memref<3x128xf32, #tpu.memory_space<vmem>>, %arg3: memref<1x128xf32, #tpu.memory_space<vmem>>, %arg4: memref<1x128xf32, #tpu.memory_space<vmem>>) attributes {dimension_semantics = [#tpu.dimension_semantics<arbitrary>], iteration_bounds = array<i64: 2>, scalar_prefetch = 0 : i64, scratch_operands = 0 : i64, tpu.core_type = #tpu.core_type<tc>, window_params = [{transform_indices = @transform_0, window_bounds = array<i64: 16, 3>}, {pipeline_mode = #tpu.pipeline_mode<synchronous>, transform_indices = @transform_1, window_bounds = array<i64: 3, 128>}, {pipeline_mode = #tpu.pipeline_mode<synchronous>, transform_indices = @transform_2, window_bounds = array<i64: 1, 128>}, {pipeline_mode = #tpu.pipeline_mode<synchronous>, transform_indices = @transform_3, window_bounds = array<i64: 1, 128>}]} {
    %c0 = arith.constant 0 : index
    %c0_0 = arith.constant 0 : index
    %0 = vector.load %arg1[%c0, %c0_0] : memref<16x3xf32, #tpu.memory_space<vmem>>, vector<16x3xf32>
    %c0_1 = arith.constant 0 : index
    %c0_2 = arith.constant 0 : index
    %1 = vector.load %arg2[%c0_1, %c0_2] : memref<3x128xf32, #tpu.memory_space<vmem>>, vector<3x128xf32>
    %2 = vector.extract_strided_slice %0 {offsets = [0, 0], sizes = [16, 1], strides = [1, 1]} : vector<16x3xf32> to vector<16x1xf32>
    %3 = vector.extract_strided_slice %1 {offsets = [0, 0], sizes = [1, 128], strides = [1, 1]} : vector<3x128xf32> to vector<1x128xf32>
    %4 = vector.broadcast %2 : vector<16x1xf32> to vector<16x128xf32>
    %5 = vector.broadcast %3 : vector<1x128xf32> to vector<16x128xf32>
    %6 = arith.mulf %4, %5 : vector<16x128xf32>
    %7 = vector.extract_strided_slice %0 {offsets = [0, 1], sizes = [16, 1], strides = [1, 1]} : vector<16x3xf32> to vector<16x1xf32>
    %8 = vector.extract_strided_slice %1 {offsets = [1, 0], sizes = [1, 128], strides = [1, 1]} : vector<3x128xf32> to vector<1x128xf32>
    %9 = vector.broadcast %7 : vector<16x1xf32> to vector<16x128xf32>
    %10 = vector.broadcast %8 : vector<1x128xf32> to vector<16x128xf32>
    %11 = arith.mulf %9, %10 : vector<16x128xf32>
    %12 = arith.addf %6, %11 : vector<16x128xf32>
    %13 = vector.extract_strided_slice %0 {offsets = [0, 2], sizes = [16, 1], strides = [1, 1]} : vector<16x3xf32> to vector<16x1xf32>
    %14 = vector.extract_strided_slice %1 {offsets = [2, 0], sizes = [1, 128], strides = [1, 1]} : vector<3x128xf32> to vector<1x128xf32>
    %15 = vector.broadcast %13 : vector<16x1xf32> to vector<16x128xf32>
    %16 = vector.broadcast %14 : vector<1x128xf32> to vector<16x128xf32>
    %17 = arith.mulf %15, %16 : vector<16x128xf32>
    %18 = arith.addf %12, %17 : vector<16x128xf32>
    %c16_i32 = arith.constant 16 : i32
    %19 = arith.muli %arg0, %c16_i32 : i32
    %c0_i32 = arith.constant 0 : i32
    %20 = arith.cmpi eq, %arg0, %c0_i32 : i32
    %cst = arith.constant dense<0.000000e+00> : vector<128xf32>
    %21 = vector.multi_reduction <add>, %18, %cst [0] : vector<16x128xf32> to vector<128xf32>
    %22 = vector.shape_cast %21 : vector<128xf32> to vector<1x128xf32>
    %cst_3 = arith.constant 1.600000e+01 : f32
    %23 = vector.broadcast %cst_3 : f32 to vector<1x128xf32>
    %24 = arith.divf %22, %23 : vector<1x128xf32>
    %25 = vector.broadcast %24 : vector<1x128xf32> to vector<16x128xf32>
    %26 = arith.subf %18, %25 : vector<16x128xf32>
    %27 = arith.mulf %26, %26 : vector<16x128xf32>
    %cst_4 = arith.constant dense<0.000000e+00> : vector<128xf32>
    %28 = vector.multi_reduction <add>, %27, %cst_4 [0] : vector<16x128xf32> to vector<128xf32>
    %29 = vector.shape_cast %28 : vector<128xf32> to vector<1x128xf32>
    %30 = arith.extui %20 : i1 to i32
    %c0_i32_5 = arith.constant 0 : i32
    %31 = arith.cmpi ne, %30, %c0_i32_5 : i32
    scf.if %31 {
      %cst_20 = arith.constant 0.000000e+00 : f32
      %52 = vector.broadcast %cst_20 : f32 to vector<1x128xf32>
      %c0_21 = arith.constant 0 : index
      %c0_22 = arith.constant 0 : index
      %53 = vector.load %arg3[%c0_21, %c0_22] : memref<1x128xf32, #tpu.memory_space<vmem>>, vector<1x128xf32>
      tpu.vector_store %arg3[%c0_21, %c0_22], %52 {strides = array<i32>} : memref<1x128xf32, #tpu.memory_space<vmem>>, vector<1x128xf32>,
      %cst_23 = arith.constant 0.000000e+00 : f32
      %54 = vector.broadcast %cst_23 : f32 to vector<1x128xf32>
      %c0_24 = arith.constant 0 : index
      %c0_25 = arith.constant 0 : index
      %55 = vector.load %arg4[%c0_24, %c0_25] : memref<1x128xf32, #tpu.memory_space<vmem>>, vector<1x128xf32>
      tpu.vector_store %arg4[%c0_24, %c0_25], %54 {strides = array<i32>} : memref<1x128xf32, #tpu.memory_space<vmem>>, vector<1x128xf32>,
    } else {
    }
    %32 = arith.sitofp %19 : i32 to f32
    %cst_6 = arith.constant 1.000000e+00 : f32
    %33 = arith.mulf %32, %cst_6 : f32
    %cst_7 = arith.constant 1.600000e+01 : f32
    %34 = arith.addf %33, %cst_7 : f32
    %c0_8 = arith.constant 0 : index
    %c0_9 = arith.constant 0 : index
    %35 = vector.load %arg3[%c0_8, %c0_9] : memref<1x128xf32, #tpu.memory_space<vmem>>, vector<1x128xf32>
    %36 = arith.subf %24, %35 : vector<1x128xf32>
    %c0_10 = arith.constant 0 : index
    %c0_11 = arith.constant 0 : index
    %37 = vector.load %arg3[%c0_10, %c0_11] : memref<1x128xf32, #tpu.memory_space<vmem>>, vector<1x128xf32>
    %cst_12 = arith.constant 1.600000e+01 : f32
    %38 = arith.divf %cst_12, %34 : f32
    %39 = vector.broadcast %38 : f32 to vector<1x128xf32>
    %40 = arith.mulf %36, %39 : vector<1x128xf32>
    %41 = arith.addf %37, %40 : vector<1x128xf32>
    %c0_13 = arith.constant 0 : index
    %c0_14 = arith.constant 0 : index
    %42 = vector.load %arg3[%c0_13, %c0_14] : memref<1x128xf32, #tpu.memory_space<vmem>>, vector<1x128xf32>
    tpu.vector_store %arg3[%c0_13, %c0_14], %41 {strides = array<i32>} : memref<1x128xf32, #tpu.memory_space<vmem>>, vector<1x128xf32>,
    %c0_15 = arith.constant 0 : index
    %c0_16 = arith.constant 0 : index
    %43 = vector.load %arg4[%c0_15, %c0_16] : memref<1x128xf32, #tpu.memory_space<vmem>>, vector<1x128xf32>
    %44 = arith.addf %43, %29 : vector<1x128xf32>
    %45 = arith.mulf %36, %36 : vector<1x128xf32>
    %cst_17 = arith.constant 1.600000e+01 : f32
    %46 = arith.mulf %33, %cst_17 : f32
    %47 = arith.divf %46, %34 : f32
    %48 = vector.broadcast %47 : f32 to vector<1x128xf32>
    %49 = arith.mulf %45, %48 : vector<1x128xf32>
    %50 = arith.addf %44, %49 : vector<1x128xf32>
    %c0_18 = arith.constant 0 : index
    %c0_19 = arith.constant 0 : index
    %51 = vector.load %arg4[%c0_18, %c0_19] : memref<1x128xf32, #tpu.memory_space<vmem>>, vector<1x128xf32>
    tpu.vector_store %arg4[%c0_18, %c0_19], %50 {strides = array<i32>} : memref<1x128xf32, #tpu.memory_space<vmem>>, vector<1x128xf32>,
    return
  }
  func.func @transform_0(%arg0: i32) -> (i32, i32) {
    %c0_i32 = arith.constant 0 : i32
    %c0_i32_0 = arith.constant 0 : i32
    return %arg0, %c0_i32 : i32, i32
  }
  func.func @transform_1(%arg0: i32) -> (i32, i32) {
    %c0_i32 = arith.constant 0 : i32
    %c0_i32_0 = arith.constant 0 : i32
    %c0_i32_1 = arith.constant 0 : i32
    return %c0_i32, %c0_i32_0 : i32, i32
  }
  func.func @transform_2(%arg0: i32) -> (i32, i32) {
    %c0_i32 = arith.constant 0 : i32
    %c0_i32_0 = arith.constant 0 : i32
    %c0_i32_1 = arith.constant 0 : i32
    return %c0_i32, %c0_i32_0 : i32, i32
  }
  func.func @transform_3(%arg0: i32) -> (i32, i32) {
    %c0_i32 = arith.constant 0 : i32
    %c0_i32_0 = arith.constant 0 : i32
    %c0_i32_1 = arith.constant 0 : i32
    return %c0_i32, %c0_i32_0 : i32, i32
  }
}

</mosaic_0001>

<bundles_post_ra>
// kernel: tpu_custom_call.1
= control target key start
LH: loop header
LB: loop body
LE: loop exit
PB: predicated region body
PF: predicated region fallthrough
CT: control target
= control target key end

     0   :  { %9 = vsyncpa [#allocation3], 0  ;;  %s547_s0 = inlined_call_operand.vmem [shape: f32[32,3], index: 0, kind: input, shape index: {}]   ;;  %s548_s1 = inlined_call_operand.vmem [shape: f32[3,128], index: 1, kind: input, shape index: {}]   ;;  %s549_s2 = inlined_call_operand.hbm [shape: f32[1,128], index: 2, kind: output, shape index: {0}]   ;;  %s550_s3 = inlined_call_operand.hbm [shape: f32[1,128], index: 3, kind: output, shape index: {1}]  }
   0x1   :  { %10 = vsyncpa [#allocation5], 0  ;;  %s470_s12 = smov 0  }
   0x2 LB: > { %s476_s13 = sadd.s32 4294967295, %s442_s12   ;;  %p331_p0 = scmp.ge.s32.totalorder %s442_s12, 1  ;;  %s442_s12 = sphi %s470_s12, %s16_s12  }
   0x3   : > { %p133_p1 = scmp.lt.s32.totalorder %s442_s12, 3 }
   0x5   : > { %p134_p2 = pnand %p331_p0, %p133_p1 }
   0x6   : > { %s332_s14 = sshll.u32 (!%p134_p2), %s476_s13, 1  ;;  %v444_v0 = vmov (!%p134_p2), 1   ;;  %v445_v1 = vmov (!%p134_p2), 0   ;;  %v446_v4 = vmov (!%p134_p2), 2   ;;  %s334_s19 = sshll.u32 (!%p134_p2), %s476_s13, 4  ;;  %v171_v5 = vlaneseq (!%p134_p2) }
   0x7   : > { %137 = sbr.rel (%p134_p2) target bundleno = 303 (0x12f), region = 28  ;;  %371 = vset.pattern.permute.xlu1 (!%p134_p2), %v444_v0  ;;  %370 = vset.pattern.permute.xlu0 (!%p134_p2), %v445_v1  ;;  %p153_p3 = scmp.lt.s32.totalorder (!%p134_p2), %s332_s14, 3  ;;  %v160_v9 = vld [vmem:[%s548_s1] sm:$0x7] (!%p134_p2) }
   0x8   : > { %v172_v6 = vshrl.u32 (!%p134_p2), %v171_v5, 7  ;;  %p335_p4 = scmp.ne.s32.totalorder (!%p134_p2), %s476_s13, 0 }
   0xa   : > { %v187_v7 = vsub.s32 (!%p134_p2), 1, %v172_v6  ;;  %v173_v8 = vsub.s32 (!%p134_p2), 0, %v172_v6  ;;  %v203_v12 = vsub.s32 (!%p134_p2), 2, %v172_v6 }
   0xc   : > { %v188_v13 = vrot.slane (!%p134_p2), %v160_v9, %v187_v7  ;;  %v174_v14 = vrot.slane (!%p134_p2), %v160_v9, %v173_v8  ;;  %v204_v17 = vrot.slane (!%p134_p2), %v160_v9, %v203_v12 }
   0xe   : > { %s552_s14 = smov (!%p153_p3, %s332_s14), 3  ;;  %v447_v49 = vmov (!%p335_p4), 0.0  }
   0xf   : > { %s333_s15 = sshll.u32 %s552_s14, 3  ;;  %234 = vst [vmem:[#allocation2] sm:$0x1] (!%p335_p4), %v447_v49  ;;  %235 = vst [vmem:[#allocation4] sm:$0x1] (!%p335_p4), %v447_v49 }
  0x10   : > { %s156_s18 = scalar_lea.vmem %s547_s0, %s333_s15 }
  0x11   : > { %v158_v2 = vld [vmem:[%s156_s18] sm:$0xff]  ;;  %v159_v3 = vld [vmem:[%s156_s18 + $0x8] sm:$0xff] }
  0x12   : > { %178 = vperm.xlu1 %371, %v158_v2   ;;  %163 = vperm.xlu0 %370, %v158_v2  }
  0x16   : > { %182 = vperm.xlu1 %371, %v159_v3   ;;  %168 = vperm.xlu0 %370, %v159_v3  }
  0x1a   : > { %373 = vset.pattern.permute.xlu1 %v446_v4  ;;  %372 = vset.pattern.permute.xlu0 %v446_v4 }
  0x1b   : > { %198 = vperm.xlu1 %373, %v159_v3   ;;  %194 = vperm.xlu0 %372, %v158_v2  }
  0x91   : > { %v179_v10 = vpop.permute.xlu1 %178  ;;  %v164_v11 = vpop.permute.xlu0 %163 }
  0x92   : > { %v189_v18 = vmul.f32 %v188_v13, %v179_v10  ;;  %v175_v19 = vmul.f32 %v174_v14, %v164_v11 }
  0x94   : > { %v191_v24 = vadd.f32 %v189_v18, %v175_v19 }
  0x95   : > { %v183_v15 = vpop.permute.xlu1 %182  ;;  %v169_v16 = vpop.permute.xlu0 %168 }
  0x96   : > { %v190_v20 = vmul.f32 %v188_v13, %v183_v15  ;;  %v176_v21 = vmul.f32 %v174_v14, %v169_v16 }
  0x98   : > { %v192_v25 = vadd.f32 %v190_v20, %v176_v21 }
  0x9a   : > { %v199_v22 = vpop.permute.xlu1 %198  ;;  %v195_v23 = vpop.permute.xlu0 %194 }
  0x9b   : > { %v206_v26 = vmul.f32 %v204_v17, %v199_v22  ;;  %v205_v27 = vmul.f32 %v204_v17, %v195_v23 }
  0x9d   : > { %v208_v28 = vadd.f32 %v206_v26, %v192_v25  ;;  %v207_v29 = vadd.f32 %v205_v27, %v191_v24 }
  0x9f   : > { %v211_v30 = vadd.f32 %v208_v28, %v207_v29 }
  0xa1   : > { %v212_v31 = vrot.slane %v211_v30, 4 }
  0xa3   : > { %v213_v32 = vadd.f32 %v212_v31, %v211_v30 }
  0xa5   : > { %v214_v33 = vrot.slane %v213_v32, 2 }
  0xa7   : > { %v215_v34 = vadd.f32 %v214_v33, %v213_v32 }
  0xa9   : > { %v216_v35 = vrot.slane %v215_v34, 1 }
  0xab   : > { %v217_v36 = vadd.f32 %v216_v35, %v215_v34 }
  0xad   : > { %v219_v37 = vmul.f32 0.0625, %v217_v36 }
  0xaf   : > { %v220_v38 = vsub.f32 %v207_v29, %v219_v37  ;;  %v221_v39 = vsub.f32 %v208_v28, %v219_v37 }
  0xb1   : > { %v222_v40 = vmul.f32 %v220_v38, %v220_v38  ;;  %v223_v41 = vmul.f32 %v221_v39, %v221_v39 }
  0xb3   : > { %v224_v42 = vadd.f32 %v223_v41, %v222_v40 }
  0xb5   : > { %v225_v43 = vrot.slane %v224_v42, 4 }
  0xb7   : > { %v226_v44 = vadd.f32 %v225_v43, %v224_v42 }
  0xb9   : > { %v227_v45 = vrot.slane %v226_v44, 2  ;;  %233 = sbr.rel (%p335_p4) target bundleno = 192 (0xc0), region = 32 }
  0xbb   : > { %v228_v46 = vadd.f32 %v227_v45, %v226_v44 }
  0xbd   : > { %v229_v47 = vrot.slane %v228_v46, 1 }
  0xbf   : > { %v230_v48 = vadd.f32 %v229_v47, %v228_v46 }
  0xc0 PF: > { %s236_s22 = scvt.s32.f32 %s334_s19  ;;  %v238_v52 = vld [vmem:[#allocation2] sm:$0x1]  ;;  %v248_v54 = vld [vmem:[#allocation4] sm:$0x1]  ;;  %s448_s28 = smov [#allocation2]  }
  0xc1   : > { %v239_v53 = vsub.f32 %v219_v37, %v238_v52  ;;  %s267_s29 = sshll.u32 %s448_s28, 4  ;;  %v249_v57 = vadd.f32 %v248_v54, %v230_v48  ;;  %s449_s30 = smov [#allocation4]   ;;  %s268_s29 = int_to_ptr.vmem [resolvable:$true] %s267_s29 }
  0xc2   : > { %s237_s23 = sadd.f32 16.0, %s236_s22  ;;  %s251_s24 = smul.f32 16.0, %s236_s22 }
  0xc3   : > { %v250_v55 = vmul.f32 %v239_v53, %v239_v53  ;;  %s278_s4 = sshll.u32 %s449_s30, 4  ;;  %p352_p5 = scmp.eq.s32.totalorder %s476_s13, 1  ;;  %s492_s4 = int_to_ptr.vmem [resolvable:$true] %s278_s4 }
  0xc4   : > { %v240_v50 = vstv %s237_s23  ;;  %s376_s5 = scalar_lea.vmem %s268_s29, 16  ;;  %s382_s6 = scalar_lea.vmem %s268_s29, 32 }
  0xc5   : > { %374 = vrcp.f32 %v240_v50  ;;  %p377_p6 = scmp.ne.s32.totalorder %s268_s29, %s376_s5  ;;  %p383_p9 = scmp.lt.s32.totalorder %s268_s29, %s268_s29 }
  0xc6   : > { %p384_p10 = scmp.lt.s32.totalorder %s382_s6, %s376_s5 }
  0xc7   : > { %p378_p7 = pnand %p377_p6, %p352_p5 }
  0xc8   : > { %p385_p11 = por %p384_p10, %p383_p9 }
  0xc9   : > { %p379_p8 = pneg %p378_p7 }
  0xcb   : > { %p386_p12 = pnand %p385_p11, %p379_p8 }
  0xcf   : > { %v375_v51 = vpop.eup %374 }
  0xd0   : > { %342 = vpush %v375_v51 }
 0x101   : > { %s343_s25 = spop %342 }
 0x102   : > { %s243_s26 = smul.f32 16.0, %s343_s25 }
 0x103   : > { %s255_s27 = smul.f32 %s343_s25, %s251_s24 }
 0x104   : > { %v244_v56 = vstv %s243_s26 }
 0x105   : > { %v245_v58 = vmul.f32 %v244_v56, %v239_v53  ;;  %v256_v59 = vstv %s255_s27 }
 0x106   : > { %v257_v60 = vmul.f32 %v256_v59, %v250_v55 }
 0x107   : > { %v246_v61 = vadd.f32 %v245_v58, %v238_v52 }
 0x108   : > { %v258_v62 = vadd.f32 %v257_v60, %v249_v57 }
 0x109   : > { %247 = vst [vmem:[#allocation2] sm:$0x1] %v246_v61 }
 0x10a   : > { %389 = shalt.err (!%p386_p12)
}
 0x10b   : > { %s390_s9 = scalar_lea.hbm %s549_s2, 16 }
 0x10c   : > { %p391_p13 = scmp.ne.s32.totalorder %s549_s2, %s390_s9  ;;  %p396_p2 = scmp.lt.u32.totalorder %s390_s9, %s549_s2 }
 0x10e   : > { %p392_p0 = pnand %p391_p13, %p352_p5 }
 0x110   : > { %p393_p1 = pneg %p392_p0 }
 0x112   : > { %p398_p3 = pnand %p396_p2, %p393_p1 }
 0x114   : > { %401 = shalt.err (!%p398_p3)
}
 0x115   : > { %345 = dma.vmem_to_hbm [thread:$0]  (%p352_p5), %s268_s29, 16, %s549_s2, [#allocation3]   ;;  %259 = vst [vmem:[#allocation4] sm:$0x1] %v258_v62 }
 0x116   : > { %s402_s18 = scalar_lea.vmem %s492_s4, 16  ;;  %s408_s19 = scalar_lea.vmem %s492_s4, 32 }
 0x117   : > { %p403_p4 = scmp.ne.s32.totalorder %s492_s4, %s402_s18  ;;  %p409_p8 = scmp.lt.s32.totalorder %s492_s4, %s492_s4 }
 0x118   : > { %p410_p9 = scmp.lt.s32.totalorder %s408_s19, %s402_s18 }
 0x119   : > { %p404_p6 = pnand %p403_p4, %p352_p5 }
 0x11a   : > { %p411_p10 = por %p410_p9, %p409_p8 }
 0x11b   : > { %p405_p7 = pneg %p404_p6 }
 0x11d   : > { %p412_p11 = pnand %p411_p10, %p405_p7 }
 0x11f   : > { %415 = shalt.err (!%p412_p11)
}
 0x120   : > { %s416_s22 = scalar_lea.hbm %s550_s3, 16 }
 0x121   : > { %p417_p12 = scmp.ne.s32.totalorder %s550_s3, %s416_s22  ;;  %p422_p1 = scmp.lt.u32.totalorder %s416_s22, %s550_s3 }
 0x123   : > { %p418_p13 = pnand %p417_p12, %p352_p5 }
 0x125   : > { %p419_p0 = pneg %p418_p13 }
 0x127   : > { %p424_p2 = pnand %p422_p1, %p419_p0 }
 0x129   : > { %427 = shalt.err (!%p424_p2)
}
 0x12a   : > { %347 = dma.vmem_to_hbm [thread:$0]  (%p352_p5), %s492_s4, 16, %s550_s3, [#allocation5]  }
 0x12b   : > { %433 = dma.done.wait (%p352_p5), [#allocation3], 16  }
 0x12c   : > { %435 = vsyncadd (%p352_p5), [#allocation3], 4294967280 }
 0x12d   : > { %437 = dma.done.wait (%p352_p5), [#allocation5], 16  }
 0x12e   : > { %439 = vsyncadd (%p352_p5), [#allocation5], 4294967280 }
 0x12f PF: > { %s16_s12 = sadd.s32 1, %s442_s12  }
 0x130   : > { %p13_p3 = scmp.ge.s32.totalorder %s16_s12, 4  }
 0x132   :  { %15 = sbr.rel (!%p13_p3) target bundleno = 2 (0x2), region = 67 }
 0x139   :  { %295 = vsyncpa [#allocation3], 1 }
 0x13a   :  { %297 = vsyncpa [#allocation3 + $0x1], 1 }
 0x13b   :  { %298 = vsyncpa [#allocation5], 1 }

</bundles_post_ra>
